<compile_context>
chip_gen: v7x
topology: tpu7x:2x2x1
jax: 0.10.0
libtpu: 0.0.40
codegen_flags: <defaults>
</compile_context>

<pallas_src>
import functools

import jax
import jax.numpy as jnp
from jax.experimental import pallas as pl
from jax.experimental.pallas import tpu as pltpu

VOCAB_CLIP = 32100  # Embedding_ slices soft distributions / weights to 32100 rows.
LANE = 128          # TPU lane width; output last dim padded to a multiple of this.


# ---------------------------------------------------------------------------
# Pallas kernel: tiled (M, K) @ (K, Dp) matmul with f32 accumulation.
# ---------------------------------------------------------------------------
def _embed_matmul_kernel(x_ref, w_ref, o_ref, acc_ref):
    @pl.when(pl.program_id(1) == 0)
    def _():
        acc_ref[...] = jnp.zeros_like(acc_ref)

    acc_ref[...] += jnp.dot(
        x_ref[...], w_ref[...], preferred_element_type=jnp.float32
    )

    @pl.when(pl.program_id(1) == pl.num_programs(1) - 1)
    def _():
        o_ref[...] = acc_ref[...].astype(o_ref.dtype)


def soft_embedding_matmul(x2d, w_padded, *, tm=128, tk=512):
    """x2d: [M, K] float, w_padded: [Kp, Dp] bf16 (pre-padded once).

    Returns [M, Dp] float32; the caller slices the D padding off.
    Zero-padded M rows / K cols contribute nothing to the accumulation.
    """
    M, K = x2d.shape
    Kp, Dp = w_padded.shape
    assert Kp % tk == 0 and Dp % LANE == 0 and K <= Kp

    Mp = pl.cdiv(M, tm) * tm
    # Cast to bf16 *before* padding so the padded copy is half the bytes.
    xp = jnp.pad(x2d.astype(jnp.bfloat16), ((0, Mp - M), (0, Kp - K)))

    out = pl.pallas_call(
        _embed_matmul_kernel,
        out_shape=jax.ShapeDtypeStruct((Mp, Dp), jnp.float32),
        grid_spec=pltpu.PrefetchScalarGridSpec(
            num_scalar_prefetch=0,
            grid=(Mp // tm, Kp // tk),
            in_specs=[
                pl.BlockSpec((tm, tk), lambda i, k: (i, k)),
                pl.BlockSpec((tk, Dp), lambda i, k: (k, 0)),
            ],
            out_specs=pl.BlockSpec((tm, Dp), lambda i, k: (i, 0)),
            scratch_shapes=[pltpu.VMEM((tm, Dp), jnp.float32)],
        ),
        compiler_params=pltpu.CompilerParams(
            dimension_semantics=("parallel", "arbitrary"),
            vmem_limit_bytes=64 * 1024 * 1024,
        ),
    )(xp, w_padded)
    return out[:M]


# ---------------------------------------------------------------------------
# One-time weight preparation (hoisted out of the per-call path).
# ---------------------------------------------------------------------------
def prepare_soft_weight(weight, *, tk=512):
    """Slice to 32100 rows, cast to bf16, pad K->tk multiple and D->128 multiple.

    Done once at init; the per-forward path never copies the full table again.
    """
    vclip = min(weight.shape[0], VOCAB_CLIP)
    w = weight[:vclip]
    K, D = w.shape
    Kp = pl.cdiv(K, tk) * tk
    Dp = pl.cdiv(D, LANE) * LANE
    return jnp.pad(w.astype(jnp.bfloat16), ((0, Kp - K), (0, Dp - D)))


# ---------------------------------------------------------------------------
# G.add_prefix  (glue: concat / one-hot scatter of the prefix tokens)
# ---------------------------------------------------------------------------
def add_prefix(x, x_attn, prefix_ids, prefix_attn):
    b = x.shape[0]
    prefix = jnp.broadcast_to(prefix_ids[None, :], (b, prefix_ids.shape[0]))
    if x.ndim == 2:
        x = jnp.concatenate([prefix, x], axis=1)
    else:
        vocab = x.shape[-1]
        prefix_oh = jax.nn.one_hot(prefix, vocab, dtype=x.dtype)
        x = jnp.concatenate([prefix_oh, x], axis=1)
    pattn = jnp.broadcast_to(prefix_attn[None, :], (b, prefix_attn.shape[0]))
    x_attn = jnp.concatenate([pattn, x_attn], axis=1)
    return x, x_attn


# ---------------------------------------------------------------------------
# Embedding_.forward
# ---------------------------------------------------------------------------
def embedding_forward(x, weight_f32, w_soft_padded, *, tm=128, tk=512):
    vocab, dim = weight_f32.shape
    if x.ndim == 2:
        # long token ids -> plain embedding row gather (no MXU, no one-hot).
        return jnp.take(weight_f32, x, axis=0)
    # 3-D soft distribution: matmul(x[:, :, :32100], W[:32100, :]) on the MXU.
    vclip = min(x.shape[-1], VOCAB_CLIP)
    b, s, _ = x.shape
    x2d = x[:, :, :vclip].reshape(b * s, vclip)
    out = soft_embedding_matmul(x2d, w_soft_padded, tm=tm, tk=tk)
    return out[:, :dim].reshape(b, s, dim)


# ---------------------------------------------------------------------------
# G.forward front end
# ---------------------------------------------------------------------------
@functools.partial(jax.jit, static_argnames=("tm", "tk"))
def g_forward(input_ids, input_attn, embed_weight, w_soft_padded,
              prefix_ids, prefix_attn, *, tm=128, tk=512):
    x, x_attn = add_prefix(input_ids, input_attn, prefix_ids, prefix_attn)
    inp_emb = embedding_forward(x, embed_weight, w_soft_padded, tm=tm, tk=tk)
    # TODO(synk): the pretrained encoder-decoder backbone
    # `self.model(inputs_embeds=inp_emb, attention_mask=x_attn, labels=...)`
    # has no architecture/weights in-script; return (embeddings, attn) instead.
    return inp_emb, x_attn


if __name__ == "__main__":
    # Small, deterministic synthetic shapes consistent with the module.
    B, S, P = 2, 8, 4          # batch, sentence length, prefix length
    V, D = 512, 64             # synthetic vocab size, embedding dim

    key = jax.random.PRNGKey(0)
    k_w, k_tok, k_soft, k_pref = jax.random.split(key, 4)

    # Deterministic "pretrained" embedding table.
    embed_weight = jax.random.normal(k_w, (V, D), dtype=jnp.float32) * 0.02
    # One-time padded/bf16 copy for the soft-embedding matmul path.
    w_soft_padded = prepare_soft_weight(embed_weight, tk=512)

    # Prefix tokens + attention (G.tokenzied_prefix / tokenzied_prefix_attn).
    prefix_ids = jax.random.randint(k_pref, (P,), 1, V).astype(jnp.int32)
    prefix_attn = jnp.ones((P,), dtype=jnp.int32)

    input_attn = jnp.ones((B, S), dtype=jnp.int32)

    # --- path 1: 3-D soft one-hot input (the gumbel-generate flow) ---------
    soft_logits = jax.random.normal(k_soft, (B, S, V), dtype=jnp.float32)
    input_soft = jax.nn.softmax(soft_logits, axis=-1)

    emb_soft, attn_soft = g_forward(
        input_soft, input_attn, embed_weight, w_soft_padded,
        prefix_ids, prefix_attn
    )
    jax.block_until_ready((emb_soft, attn_soft))
    assert emb_soft.shape == (B, P + S, D)
    assert attn_soft.shape == (B, P + S)

    # --- path 2: 2-D long token ids (gather path) ---------------------------
    input_ids = jax.random.randint(k_tok, (B, S), 1, V).astype(jnp.int32)
    emb_hard, attn_hard = g_forward(
        input_ids, input_attn, embed_weight, w_soft_padded,
        prefix_ids, prefix_attn
    )
    jax.block_until_ready((emb_hard, attn_hard))
    assert emb_hard.shape == (B, P + S, D)

    # Reference check of the Pallas matmul against plain f32 JAX
    # (bf16 operands -> loose tolerance).
    x_ref, _ = add_prefix(input_soft, input_attn, prefix_ids, prefix_attn)
    ref = jnp.einsum("bsv,vd->bsd", x_ref, embed_weight)
    assert jnp.allclose(emb_soft, ref, atol=2e-3, rtol=2e-2), (
        float(jnp.max(jnp.abs(emb_soft - ref)))
    )

    ref_hard = embed_weight[
        jnp.concatenate(
            [jnp.broadcast_to(prefix_ids[None, :], (B, P)), input_ids], axis=1
        )
    ]
    assert jnp.allclose(emb_hard, ref_hard, atol=1e-6, rtol=1e-6)

    print("KERNEL_OK")
</pallas_src>

<mosaic_0001>
module attributes {stable_mosaic.version = 11 : i64} {
  func.func @_embed_matmul_kernel(%arg0: i32, %arg1: i32, %arg2: memref<128x512xbf16, #tpu.memory_space<vmem>>, %arg3: memref<512x128xbf16, #tpu.memory_space<vmem>>, %arg4: memref<128x128xf32, #tpu.memory_space<vmem>>, %arg5: memref<128x128xf32, #tpu.memory_space<vmem>>) attributes {dimension_semantics = [#tpu.dimension_semantics<parallel>, #tpu.dimension_semantics<arbitrary>], iteration_bounds = array<i64: 1, 1>, scalar_prefetch = 0 : i64, scratch_operands = 1 : i64, tpu.core_type = #tpu.core_type<tc>, window_params = [{transform_indices = @transform_0, window_bounds = array<i64: 128, 512>}, {transform_indices = @transform_1, window_bounds = array<i64: 512, 128>}, {transform_indices = @transform_2, window_bounds = array<i64: 128, 128>}]} {
    %c0_i32 = arith.constant 0 : i32
    %0 = arith.cmpi eq, %arg1, %c0_i32 : i32
    %1 = arith.extui %0 : i1 to i32
    %c0_i32_0 = arith.constant 0 : i32
    %2 = arith.cmpi ne, %1, %c0_i32_0 : i32
    scf.if %2 {
      %cst_10 = arith.constant 0.000000e+00 : f32
      %12 = vector.broadcast %cst_10 : f32 to vector<128x128xf32>
      %c0_11 = arith.constant 0 : index
      %c0_12 = arith.constant 0 : index
      %13 = vector.load %arg5[%c0_11, %c0_12] : memref<128x128xf32, #tpu.memory_space<vmem>>, vector<128x128xf32>
      tpu.vector_store %arg5[%c0_11, %c0_12], %12 {strides = array<i32>} : memref<128x128xf32, #tpu.memory_space<vmem>>, vector<128x128xf32>,
    } else {
    }
    %c0 = arith.constant 0 : index
    %c0_1 = arith.constant 0 : index
    %3 = vector.load %arg5[%c0, %c0_1] : memref<128x128xf32, #tpu.memory_space<vmem>>, vector<128x128xf32>
    %c0_2 = arith.constant 0 : index
    %c0_3 = arith.constant 0 : index
    %4 = vector.load %arg2[%c0_2, %c0_3] : memref<128x512xbf16, #tpu.memory_space<vmem>>, vector<128x512xbf16>
    %c0_4 = arith.constant 0 : index
    %c0_5 = arith.constant 0 : index
    %5 = vector.load %arg3[%c0_4, %c0_5] : memref<512x128xbf16, #tpu.memory_space<vmem>>, vector<512x128xbf16>
    %cst = arith.constant dense<0.000000e+00> : vector<128x128xf32>
    %6 = tpu.matmul %4, %5, %cst {dimension_numbers = #tpu.dot_dimension_numbers<[1], [0], [0], [1], [0, 0, 1, 1], [], []>} : vector<128x512xbf16>, vector<512x128xbf16>, vector<128x128xf32> -> vector<128x128xf32>
    %7 = arith.addf %3, %6 : vector<128x128xf32>
    %c0_6 = arith.constant 0 : index
    %c0_7 = arith.constant 0 : index
    %8 = vector.load %arg5[%c0_6, %c0_7] : memref<128x128xf32, #tpu.memory_space<vmem>>, vector<128x128xf32>
    tpu.vector_store %arg5[%c0_6, %c0_7], %7 {strides = array<i32>} : memref<128x128xf32, #tpu.memory_space<vmem>>, vector<128x128xf32>,
    %c0_i32_8 = arith.constant 0 : i32
    %9 = arith.cmpi eq, %arg1, %c0_i32_8 : i32
    %10 = arith.extui %9 : i1 to i32
    %c0_i32_9 = arith.constant 0 : i32
    %11 = arith.cmpi ne, %10, %c0_i32_9 : i32
    scf.if %11 {
      %c0_10 = arith.constant 0 : index
      %c0_11 = arith.constant 0 : index
      %12 = vector.load %arg5[%c0_10, %c0_11] : memref<128x128xf32, #tpu.memory_space<vmem>>, vector<128x128xf32>
      %c0_12 = arith.constant 0 : index
      %c0_13 = arith.constant 0 : index
      %13 = vector.load %arg4[%c0_12, %c0_13] : memref<128x128xf32, #tpu.memory_space<vmem>>, vector<128x128xf32>
      tpu.vector_store %arg4[%c0_12, %c0_13], %12 {strides = array<i32>} : memref<128x128xf32, #tpu.memory_space<vmem>>, vector<128x128xf32>,
    } else {
    }
    return
  }
  func.func @transform_0(%arg0: i32, %arg1: i32) -> (i32, i32) {
    %c0_i32 = arith.constant 0 : i32
    return %arg0, %arg1 : i32, i32
  }
  func.func @transform_1(%arg0: i32, %arg1: i32) -> (i32, i32) {
    %c0_i32 = arith.constant 0 : i32
    %c0_i32_0 = arith.constant 0 : i32
    return %arg1, %c0_i32 : i32, i32
  }
  func.func @transform_2(%arg0: i32, %arg1: i32) -> (i32, i32) {
    %c0_i32 = arith.constant 0 : i32
    %c0_i32_0 = arith.constant 0 : i32
    return %arg0, %c0_i32 : i32, i32
  }
}

</mosaic_0001>

<bundles_post_ra>
// kernel: g_forward.1
= control target key start
LH: loop header
LB: loop body
LE: loop exit
PB: predicated region body
PF: predicated region fallthrough
CT: control target
= control target key end

     0   :  { %7 = vsyncpa [#allocation4], 0  ;;  %s1217_s0 = inlined_call_operand.hbm [shape: bf16[128,512], index: 0, kind: input, shape index: {}]   ;;  %s1218_s1 = inlined_call_operand.hbm [shape: bf16[512,128], index: 1, kind: input, shape index: {}]   ;;  %s1219_s2 = inlined_call_operand.hbm [shape: f32[128,128], index: 2, kind: output, shape index: {}]  }
   0x1   :  { %8 = vsyncpa [#allocation7], 0 }
   0x2   :  { %9 = vsyncpa [#allocation5], 0  ;;  %s1157_s9 = smov [#allocation3]   ;;  %s1085_s13 = scalar_lea.hbm %s1217_s0, 4096 }
   0x3   :  { %s15_s10 = sshll.u32 %s1157_s9, 4  ;;  %p1086_p0 = scmp.ne.s32.totalorder %s1217_s0, %s1085_s13  ;;  %s16_s10 = int_to_ptr.vmem [resolvable:$true] %s15_s10 }
   0x4   :  { %p1089_p1 = scmp.lt.u32.totalorder %s1085_s13, %s1217_s0 }
   0x6   :  { %p1091_p2 = pnand %p1089_p1, %p1086_p0 }
   0x8   :  { %1094 = shalt.err (!%p1091_p2)
}
   0x9   :  { %s1095_s18 = scalar_lea.vmem %s16_s10, 4096  ;;  %p1100_p4 = scmp.lt.s32.totalorder %s16_s10, %s16_s10 }
   0xa   :  { %p1096_p3 = scmp.ne.s32.totalorder %s16_s10, %s1095_s18  ;;  %p1101_p5 = scmp.lt.s32.totalorder %s1095_s18, %s1095_s18 }
   0xc   :  { %p1102_p6 = por %p1101_p5, %p1100_p4 }
   0xe   :  { %p1103_p7 = pnand %p1102_p6, %p1096_p3 }
  0x10   :  { %1106 = shalt.err (!%p1103_p7)
}
  0x11   :  { %s1158_s19 = smov 256   ;;  %s1159_s20 = smov 16  }
  0x12   :  { %21 = dma.hbm_to_vmem [thread:$0]  %s1217_s0, 4096, %s16_s10, [#allocation4], %s1158_s19, %s1158_s19, %s1159_s20  }
  0x13   :  { %s1160_s23 = smov [#allocation6]   ;;  %s1107_s27 = scalar_lea.hbm %s1218_s1, 4096 }
  0x14   :  { %s27_s24 = sshll.u32 %s1160_s23, 4  ;;  %p1108_p8 = scmp.ne.s32.totalorder %s1218_s1, %s1107_s27  ;;  %s28_s24 = int_to_ptr.vmem [resolvable:$true] %s27_s24 }
  0x15   :  { %p1111_p9 = scmp.lt.u32.totalorder %s1107_s27, %s1218_s1 }
  0x17   :  { %p1113_p10 = pnand %p1111_p9, %p1108_p8 }
  0x19   :  { %1116 = shalt.err (!%p1113_p10)
}
  0x1a   :  { %s1117_s4 = scalar_lea.vmem %s28_s24, 4096  ;;  %p1122_p12 = scmp.lt.s32.totalorder %s28_s24, %s28_s24 }
  0x1b   :  { %p1118_p11 = scmp.ne.s32.totalorder %s28_s24, %s1117_s4  ;;  %p1123_p13 = scmp.lt.s32.totalorder %s1117_s4, %s1117_s4 }
  0x1d   :  { %p1124_p0 = por %p1123_p13, %p1122_p12 }
  0x1f   :  { %p1125_p1 = pnand %p1124_p0, %p1118_p11 }
  0x21   :  { %1128 = shalt.err (!%p1125_p1)
}
  0x22   :  { %s1161_s0 = smov 64   ;;  %s1162_s5 = smov 4  }
  0x23   :  { %33 = dma.hbm_to_vmem [thread:$0]  %s1218_s1, 4096, %s28_s24, [#allocation7], %s1161_s0, %s1161_s0, %s1162_s5  }
  0x24   :  { %1151 = dma.done.wait [#allocation4], 4096  }
  0x25   :  { %1152 = vsyncadd [#allocation4], 4294963200 }
  0x26   :  { %1153 = dma.done.wait [#allocation7], 4096  }
  0x27   :  { %1154 = vsyncadd [#allocation7], 4294963200  ;;  %v1005_v0 = vld [vmem:[#allocation6 + $0x40] sm:$0xff]   ;;  %v1009_v4 = vld [vmem:[#allocation6 + $0x48] sm:$0xff]   ;;  %s1163_s1 = smov [#allocation8]  }
  0x28   :  { %v1006_v1 = vld [vmem:[#allocation6 + $0xc0] sm:$0xff]   ;;  %868 = vmatprep.subr.bf16.mxu0 %v1005_v0  ;;  %v1010_v5 = vld [vmem:[#allocation6 + $0xc8] sm:$0xff]   ;;  %v1013_v8 = vld [vmem:[#allocation6 + $0x50] sm:$0xff]   ;;  %s791_s8 = sshll.u32 %s1163_s1, 4  ;;  %s792_s8 = int_to_ptr.vmem [resolvable:$true] %s791_s8 }
  0x29   :  { %v1007_v2 = vld [vmem:[#allocation6] sm:$0xff]   ;;  %932 = vmatprep.subr.bf16.mxu1 %v1006_v1  ;;  %v1011_v6 = vld [vmem:[#allocation6 + $0x8] sm:$0xff]   ;;  %v1014_v9 = vld [vmem:[#allocation6 + $0xd0] sm:$0xff]   ;;  %s1129_s9 = scalar_lea.vmem %s792_s8, 2048  ;;  %p1134_p3 = scmp.lt.s32.totalorder %s792_s8, %s792_s8 }
  0x2a   :  { %v1008_v3 = vld [vmem:[#allocation6 + $0x80] sm:$0xff]   ;;  %869 = vmatpush3.bf16.msra.mxu0 %v1007_v2  ;;  %v1012_v7 = vld [vmem:[#allocation6 + $0x88] sm:$0xff]   ;;  %v1015_v10 = vld [vmem:[#allocation6 + $0x10] sm:$0xff]   ;;  %p1130_p2 = scmp.ne.s32.totalorder %s792_s8, %s1129_s9  ;;  %p1135_p4 = scmp.lt.s32.totalorder %s1129_s9, %s1129_s9 }
  0x2b   :  { %933 = vmatpush3.bf16.msra.mxu1 %v1008_v3  ;;  %870 = vmatprep.subr.bf16.mxu0 %v1009_v4  ;;  %v1016_v11 = vld [vmem:[#allocation6 + $0x90] sm:$0xff]   ;;  %v1017_v12 = vld [vmem:[#allocation6 + $0x58] sm:$0xff]   ;;  %v1021_v16 = vld [vmem:[#allocation6 + $0x60] sm:$0xff]  }
  0x2c   :  { %934 = vmatprep.subr.bf16.mxu1 %v1010_v5  ;;  %v1018_v13 = vld [vmem:[#allocation6 + $0xd8] sm:$0xff]   ;;  %v1022_v17 = vld [vmem:[#allocation6 + $0xe0] sm:$0xff]   ;;  %v1025_v20 = vld [vmem:[#allocation6 + $0x68] sm:$0xff]   ;;  %p1136_p5 = por %p1135_p4, %p1134_p3 }
  0x2d   :  { %v1019_v14 = vld [vmem:[#allocation6 + $0x18] sm:$0xff]   ;;  %v1023_v18 = vld [vmem:[#allocation6 + $0x20] sm:$0xff]   ;;  %v1026_v21 = vld [vmem:[#allocation6 + $0xe8] sm:$0xff]  }
  0x2e   :  { %871 = vmatpush3.bf16.msra.mxu0 %v1011_v6  ;;  %v1020_v15 = vld [vmem:[#allocation6 + $0x98] sm:$0xff]   ;;  %v1024_v19 = vld [vmem:[#allocation6 + $0xa0] sm:$0xff]   ;;  %v1027_v22 = vld [vmem:[#allocation6 + $0x28] sm:$0xff]   ;;  %p1137_p6 = pnand %p1136_p5, %p1130_p2 }
  0x2f   :  { %935 = vmatpush3.bf16.msra.mxu1 %v1012_v7  ;;  %872 = vmatprep.subr.bf16.mxu0 %v1013_v8  ;;  %v1028_v23 = vld [vmem:[#allocation6 + $0xa8] sm:$0xff]   ;;  %v1029_v24 = vld [vmem:[#allocation6 + $0x70] sm:$0xff]   ;;  %v1033_v28 = vld [vmem:[#allocation6 + $0x78] sm:$0xff]  }
  0x30   :  { %936 = vmatprep.subr.bf16.mxu1 %v1014_v9  ;;  %v1030_v25 = vld [vmem:[#allocation6 + $0xf0] sm:$0xff]   ;;  %v1034_v29 = vld [vmem:[#allocation6 + $0xf8] sm:$0xff]  }
  0x31   :  { %v1031_v26 = vld [vmem:[#allocation6 + $0x30] sm:$0xff]   ;;  %v1035_v30 = vld [vmem:[#allocation6 + $0x38] sm:$0xff]  }
  0x32   :  { %873 = vmatpush3.bf16.msra.mxu0 %v1015_v10  ;;  %v1032_v27 = vld [vmem:[#allocation6 + $0xb0] sm:$0xff]   ;;  %v1036_v31 = vld [vmem:[#allocation6 + $0xb8] sm:$0xff]  }
  0x33   :  { %937 = vmatpush3.bf16.msra.mxu1 %v1016_v11  ;;  %874 = vmatprep.subr.bf16.mxu0 %v1017_v12  ;;  %v1037_v32 = vld [vmem:[#allocation3] ss:$16 sps:$4 sm:$0xff]   ;;  %v1039_v33 = vld [vmem:[#allocation3 + $0x4] ss:$16 sps:$4 sm:$0xff]   ;;  %v1040_v34 = vld [vmem:[#allocation3 + $0x8] ss:$16 sps:$4 sm:$0xff]  }
  0x34   :  { %938 = vmatprep.subr.bf16.mxu1 %v1018_v13  ;;  %v1042_v35 = vld [vmem:[#allocation3 + $0xc] ss:$16 sps:$4 sm:$0xff]   ;;  %557 = vmatprep.mubr.bf16.mxu0 %v1039_v33  ;;  %v1043_v36 = vld [vmem:[#allocation3 + $0x24] ss:$16 sps:$4 sm:$0xff]   ;;  %v1047_v38 = vld [vmem:[#allocation3 + $0x20] ss:$16 sps:$4 sm:$0xff]  }
  0x35   :  { %654 = vmatprep.mubr.bf16.mxu1 %v1042_v35  ;;  %v1045_v37 = vld [vmem:[#allocation3 + $0x2c] ss:$16 sps:$4 sm:$0xff]   ;;  %v1048_v39 = vld [vmem:[#allocation3 + $0x28] ss:$16 sps:$4 sm:$0xff]   ;;  %v1049_v40 = vld [vmem:[#allocation3 + $0x44] ss:$16 sps:$4 sm:$0xff]  }
  0x36   :  { %875 = vmatpush3.bf16.msra.mxu0 %v1019_v14  ;;  %v1051_v41 = vld [vmem:[#allocation3 + $0x4c] ss:$16 sps:$4 sm:$0xff]   ;;  %v1053_v42 = vld [vmem:[#allocation3 + $0x40] ss:$16 sps:$4 sm:$0xff]   ;;  %v1054_v43 = vld [vmem:[#allocation3 + $0x48] ss:$16 sps:$4 sm:$0xff]  }
  0x37   :  { %939 = vmatpush3.bf16.msra.mxu1 %v1020_v15  ;;  %876 = vmatprep.subr.bf16.mxu0 %v1021_v16  ;;  %v1055_v44 = vld [vmem:[#allocation3 + $0x64] ss:$16 sps:$4 sm:$0xff]   ;;  %v1057_v45 = vld [vmem:[#allocation3 + $0x6c] ss:$16 sps:$4 sm:$0xff]   ;;  %v1059_v46 = vld [vmem:[#allocation3 + $0x60] ss:$16 sps:$4 sm:$0xff]  }
  0x38   :  { %940 = vmatprep.subr.bf16.mxu1 %v1022_v17  ;;  %v1060_v47 = vld [vmem:[#allocation3 + $0x68] ss:$16 sps:$4 sm:$0xff]   ;;  %v1061_v48 = vld [vmem:[#allocation3 + $0x84] ss:$16 sps:$4 sm:$0xff]   ;;  %v1063_v49 = vld [vmem:[#allocation3 + $0x8c] ss:$16 sps:$4 sm:$0xff]  }
  0x39   :  { %v1065_v50 = vld [vmem:[#allocation3 + $0x80] ss:$16 sps:$4 sm:$0xff]   ;;  %v1066_v51 = vld [vmem:[#allocation3 + $0x88] ss:$16 sps:$4 sm:$0xff]   ;;  %v1067_v52 = vld [vmem:[#allocation3 + $0xa4] ss:$16 sps:$4 sm:$0xff]  }
  0x3a   :  { %877 = vmatpush3.bf16.msra.mxu0 %v1023_v18  ;;  %v1069_v53 = vld [vmem:[#allocation3 + $0xac] ss:$16 sps:$4 sm:$0xff]   ;;  %v1071_v54 = vld [vmem:[#allocation3 + $0xa0] ss:$16 sps:$4 sm:$0xff]   ;;  %v1072_v55 = vld [vmem:[#allocation3 + $0xa8] ss:$16 sps:$4 sm:$0xff]  }
  0x3b   :  { %941 = vmatpush3.bf16.msra.mxu1 %v1024_v19  ;;  %878 = vmatprep.subr.bf16.mxu0 %v1025_v20  ;;  %v1073_v56 = vld [vmem:[#allocation3 + $0xc4] ss:$16 sps:$4 sm:$0xff]   ;;  %v1075_v57 = vld [vmem:[#allocation3 + $0xcc] ss:$16 sps:$4 sm:$0xff]   ;;  %v1077_v58 = vld [vmem:[#allocation3 + $0xc0] ss:$16 sps:$4 sm:$0xff]  }
  0x3c   :  { %942 = vmatprep.subr.bf16.mxu1 %v1026_v21  ;;  %v1078_v59 = vld [vmem:[#allocation3 + $0xc8] ss:$16 sps:$4 sm:$0xff]   ;;  %v1079_v60 = vld [vmem:[#allocation3 + $0xe4] ss:$16 sps:$4 sm:$0xff]   ;;  %v1081_v61 = vld [vmem:[#allocation3 + $0xec] ss:$16 sps:$4 sm:$0xff]  }
  0x3d   :  { %v1083_v62 = vld [vmem:[#allocation3 + $0xe0] ss:$16 sps:$4 sm:$0xff]   ;;  %v1084_v63 = vld [vmem:[#allocation3 + $0xe8] ss:$16 sps:$4 sm:$0xff]  }
  0x3e   :  { %879 = vmatpush3.bf16.msra.mxu0 %v1027_v22 }
  0x3f   :  { %943 = vmatpush3.bf16.msra.mxu1 %v1028_v23  ;;  %880 = vmatprep.subr.bf16.mxu0 %v1029_v24 }
  0x40   :  { %944 = vmatprep.subr.bf16.mxu1 %v1030_v25 }
  0x42   :  { %881 = vmatpush3.bf16.msra.mxu0 %v1031_v26 }
  0x43   :  { %945 = vmatpush3.bf16.msra.mxu1 %v1032_v27  ;;  %882 = vmatprep.subr.bf16.mxu0 %v1033_v28 }
  0x44   :  { %946 = vmatprep.subr.bf16.mxu1 %v1034_v29 }
  0x46   :  { %883 = vmatpush3.bf16.msra.mxu0 %v1035_v30 }
  0x47   :  { %947 = vmatpush3.bf16.msra.mxu1 %v1036_v31 }
  0x49   :  { %558 = vmatmul.mubr.bf16.vlgmr.msra.gmra.mrb[0].mxu0 %v1037_v32 }
  0x4a   :  { %655 = vmatmul.mubr.bf16.vlgmr.msra.gmra.mrb[0].mxu1 %v1040_v34  ;;  %565 = vmatprep.mubr.bf16.mxu0 %v1043_v36 }
  0x4b   :  { %662 = vmatprep.mubr.bf16.mxu1 %v1045_v37 }
  0x51   :  { %566 = vmatmul.mubr.bf16.gmra.mrb[4].mxu0 %v1047_v38 }
  0x52   :  { %663 = vmatmul.mubr.bf16.gmra.mrb[4].mxu1 %v1048_v39  ;;  %573 = vmatprep.mubr.bf16.mxu0 %v1049_v40 }
  0x53   :  { %670 = vmatprep.mubr.bf16.mxu1 %v1051_v41 }
  0x59   :  { %574 = vmatmul.mubr.bf16.gmra.mrb[8].mxu0 %v1053_v42 }
  0x5a   :  { %671 = vmatmul.mubr.bf16.gmra.mrb[8].mxu1 %v1054_v43  ;;  %581 = vmatprep.mubr.bf16.mxu0 %v1055_v44 }
  0x5b   :  { %678 = vmatprep.mubr.bf16.mxu1 %v1057_v45 }
  0x61   :  { %582 = vmatmul.mubr.bf16.gmra.mrb[12].mxu0 %v1059_v46 }
  0x62   :  { %679 = vmatmul.mubr.bf16.gmra.mrb[12].mxu1 %v1060_v47  ;;  %589 = vmatprep.mubr.bf16.mxu0 %v1061_v48 }
  0x63   :  { %686 = vmatprep.mubr.bf16.mxu1 %v1063_v49 }
  0x69   :  { %590 = vmatmul.mubr.bf16.gmra.mrb[16].mxu0 %v1065_v50 }
  0x6a   :  { %687 = vmatmul.mubr.bf16.gmra.mrb[16].mxu1 %v1066_v51  ;;  %597 = vmatprep.mubr.bf16.mxu0 %v1067_v52 }
  0x6b   :  { %694 = vmatprep.mubr.bf16.mxu1 %v1069_v53 }
  0x71   :  { %598 = vmatmul.mubr.bf16.gmra.mrb[20].mxu0 %v1071_v54 }
  0x72   :  { %695 = vmatmul.mubr.bf16.gmra.mrb[20].mxu1 %v1072_v55  ;;  %605 = vmatprep.mubr.bf16.mxu0 %v1073_v56 }
  0x73   :  { %702 = vmatprep.mubr.bf16.mxu1 %v1075_v57 }
  0x79   :  { %606 = vmatmul.mubr.bf16.gmra.mrb[24].mxu0 %v1077_v58 }
  0x7a   :  { %703 = vmatmul.mubr.bf16.gmra.mrb[24].mxu1 %v1078_v59  ;;  %613 = vmatprep.mubr.bf16.mxu0 %v1079_v60 }
  0x7b   :  { %710 = vmatprep.mubr.bf16.mxu1 %v1081_v61 }
  0x81   :  { %614 = vmatmul.mubr.bf16.gmra.mrb[28].mxu0 %v1083_v62 }
  0x82   :  { %711 = vmatmul.mubr.bf16.gmra.mrb[28].mxu1 %v1084_v63 }
 0x11c   :  { %v884_v0 = vpop.f32.mrb[0].mxu0 }
 0x11d   :  { %v948_v1 = vpop.f32.mrb[0].mxu1  ;;  %v885_v2 = vpop.f32.mrb[1].mxu0 }
 0x11e   :  { %v886_v3 = vadd.f32 %v885_v2, %v884_v0  ;;  %v949_v4 = vpop.f32.mrb[1].mxu1  ;;  %v887_v5 = vpop.f32.mrb[2].mxu0 }
 0x11f   :  { %v950_v6 = vadd.f32 %v949_v4, %v948_v1  ;;  %v951_v7 = vpop.f32.mrb[2].mxu1  ;;  %v888_v8 = vpop.f32.mrb[3].mxu0 }
 0x120   :  { %v889_v9 = vadd.f32 %v888_v8, %v887_v5  ;;  %v952_v10 = vpop.f32.mrb[3].mxu1 }
 0x121   :  { %v657_v11 = vadd.f32 %v950_v6, %v886_v3  ;;  %v953_v12 = vadd.f32 %v952_v10, %v951_v7 }
 0x123   :  { %770 = vst [vmem:[#allocation8] sm:$0xff] %v657_v11  ;;  %v660_v13 = vadd.f32 %v953_v12, %v889_v9 }
 0x124   :  { %v890_v14 = vpop.f32.mrb[4].mxu0 }
 0x125   :  { %771 = vst [vmem:[#allocation8 + $0x8] sm:$0xff] %v660_v13  ;;  %v954_v15 = vpop.f32.mrb[4].mxu1  ;;  %v891_v16 = vpop.f32.mrb[5].mxu0 }
 0x126   :  { %v892_v17 = vadd.f32 %v891_v16, %v890_v14  ;;  %v955_v18 = vpop.f32.mrb[5].mxu1  ;;  %v893_v19 = vpop.f32.mrb[6].mxu0 }
 0x127   :  { %v956_v20 = vadd.f32 %v955_v18, %v954_v15  ;;  %v957_v21 = vpop.f32.mrb[6].mxu1  ;;  %v894_v22 = vpop.f32.mrb[7].mxu0 }
 0x128   :  { %v895_v23 = vadd.f32 %v894_v22, %v893_v19  ;;  %v958_v24 = vpop.f32.mrb[7].mxu1 }
 0x129   :  { %v665_v25 = vadd.f32 %v956_v20, %v892_v17  ;;  %v959_v26 = vadd.f32 %v958_v24, %v957_v21 }
 0x12b   :  { %772 = vst [vmem:[#allocation8 + $0x10] sm:$0xff] %v665_v25  ;;  %v668_v27 = vadd.f32 %v959_v26, %v895_v23 }
 0x12c   :  { %v896_v28 = vpop.f32.mrb[8].mxu0 }
 0x12d   :  { %773 = vst [vmem:[#allocation8 + $0x18] sm:$0xff] %v668_v27  ;;  %v960_v29 = vpop.f32.mrb[8].mxu1  ;;  %v897_v30 = vpop.f32.mrb[9].mxu0 }
 0x12e   :  { %v898_v31 = vadd.f32 %v897_v30, %v896_v28  ;;  %v961_v32 = vpop.f32.mrb[9].mxu1  ;;  %v899_v33 = vpop.f32.mrb[10].mxu0 }
 0x12f   :  { %v962_v34 = vadd.f32 %v961_v32, %v960_v29  ;;  %v963_v35 = vpop.f32.mrb[10].mxu1  ;;  %v900_v36 = vpop.f32.mrb[11].mxu0 }
 0x130   :  { %v901_v37 = vadd.f32 %v900_v36, %v899_v33  ;;  %v964_v38 = vpop.f32.mrb[11].mxu1 }
 0x131   :  { %v673_v39 = vadd.f32 %v962_v34, %v898_v31  ;;  %v965_v40 = vadd.f32 %v964_v38, %v963_v35 }
 0x133   :  { %774 = vst [vmem:[#allocation8 + $0x20] sm:$0xff] %v673_v39  ;;  %v676_v41 = vadd.f32 %v965_v40, %v901_v37 }
 0x134   :  { %v902_v42 = vpop.f32.mrb[12].mxu0 }
 0x135   :  { %775 = vst [vmem:[#allocation8 + $0x28] sm:$0xff] %v676_v41  ;;  %v966_v43 = vpop.f32.mrb[12].mxu1  ;;  %v903_v44 = vpop.f32.mrb[13].mxu0 }
 0x136   :  { %v904_v45 = vadd.f32 %v903_v44, %v902_v42  ;;  %v967_v46 = vpop.f32.mrb[13].mxu1  ;;  %v905_v47 = vpop.f32.mrb[14].mxu0 }
 0x137   :  { %v968_v48 = vadd.f32 %v967_v46, %v966_v43  ;;  %v969_v49 = vpop.f32.mrb[14].mxu1  ;;  %v906_v50 = vpop.f32.mrb[15].mxu0 }
 0x138   :  { %v907_v51 = vadd.f32 %v906_v50, %v905_v47  ;;  %v970_v52 = vpop.f32.mrb[15].mxu1 }
 0x139   :  { %v681_v53 = vadd.f32 %v968_v48, %v904_v45  ;;  %v971_v54 = vadd.f32 %v970_v52, %v969_v49 }
 0x13b   :  { %776 = vst [vmem:[#allocation8 + $0x30] sm:$0xff] %v681_v53  ;;  %v684_v55 = vadd.f32 %v971_v54, %v907_v51 }
 0x13c   :  { %v908_v56 = vpop.f32.mrb[16].mxu0 }
 0x13d   :  { %777 = vst [vmem:[#allocation8 + $0x38] sm:$0xff] %v684_v55  ;;  %v972_v57 = vpop.f32.mrb[16].mxu1  ;;  %v909_v58 = vpop.f32.mrb[17].mxu0 }
 0x13e   :  { %v910_v59 = vadd.f32 %v909_v58, %v908_v56  ;;  %v973_v60 = vpop.f32.mrb[17].mxu1  ;;  %v911_v61 = vpop.f32.mrb[18].mxu0 }
 0x13f   :  { %v974_v62 = vadd.f32 %v973_v60, %v972_v57  ;;  %v975_v63 = vpop.f32.mrb[18].mxu1  ;;  %v912_v0 = vpop.f32.mrb[19].mxu0 }
 0x140   :  { %v913_v1 = vadd.f32 %v912_v0, %v911_v61  ;;  %v976_v2 = vpop.f32.mrb[19].mxu1 }
 0x141   :  { %v689_v3 = vadd.f32 %v974_v62, %v910_v59  ;;  %v977_v4 = vadd.f32 %v976_v2, %v975_v63 }
 0x143   :  { %778 = vst [vmem:[#allocation8 + $0x40] sm:$0xff] %v689_v3  ;;  %v692_v5 = vadd.f32 %v977_v4, %v913_v1 }
 0x144   :  { %v914_v6 = vpop.f32.mrb[20].mxu0 }
 0x145   :  { %779 = vst [vmem:[#allocation8 + $0x48] sm:$0xff] %v692_v5  ;;  %v978_v7 = vpop.f32.mrb[20].mxu1  ;;  %v915_v8 = vpop.f32.mrb[21].mxu0 }
 0x146   :  { %v916_v9 = vadd.f32 %v915_v8, %v914_v6  ;;  %v979_v10 = vpop.f32.mrb[21].mxu1  ;;  %v917_v11 = vpop.f32.mrb[22].mxu0 }
 0x147   :  { %v980_v12 = vadd.f32 %v979_v10, %v978_v7  ;;  %v981_v13 = vpop.f32.mrb[22].mxu1  ;;  %v918_v14 = vpop.f32.mrb[23].mxu0 }
 0x148   :  { %v919_v15 = vadd.f32 %v918_v14, %v917_v11  ;;  %v982_v16 = vpop.f32.mrb[23].mxu1 }
 0x149   :  { %v697_v17 = vadd.f32 %v980_v12, %v916_v9  ;;  %v983_v18 = vadd.f32 %v982_v16, %v981_v13 }
 0x14b   :  { %780 = vst [vmem:[#allocation8 + $0x50] sm:$0xff] %v697_v17  ;;  %v700_v19 = vadd.f32 %v983_v18, %v919_v15 }
 0x14c   :  { %v920_v20 = vpop.f32.mrb[24].mxu0 }
 0x14d   :  { %781 = vst [vmem:[#allocation8 + $0x58] sm:$0xff] %v700_v19  ;;  %v984_v21 = vpop.f32.mrb[24].mxu1  ;;  %v921_v22 = vpop.f32.mrb[25].mxu0 }
 0x14e   :  { %v922_v23 = vadd.f32 %v921_v22, %v920_v20  ;;  %v985_v24 = vpop.f32.mrb[25].mxu1  ;;  %v923_v25 = vpop.f32.mrb[26].mxu0 }
 0x14f   :  { %v986_v26 = vadd.f32 %v985_v24, %v984_v21  ;;  %v987_v27 = vpop.f32.mrb[26].mxu1  ;;  %v924_v28 = vpop.f32.mrb[27].mxu0 }
 0x150   :  { %v925_v29 = vadd.f32 %v924_v28, %v923_v25  ;;  %v988_v30 = vpop.f32.mrb[27].mxu1 }
 0x151   :  { %v705_v31 = vadd.f32 %v986_v26, %v922_v23  ;;  %v989_v32 = vadd.f32 %v988_v30, %v987_v27 }
 0x153   :  { %782 = vst [vmem:[#allocation8 + $0x60] sm:$0xff] %v705_v31  ;;  %v708_v33 = vadd.f32 %v989_v32, %v925_v29 }
 0x154   :  { %v926_v34 = vpop.f32.mrb[28].mxu0 }
 0x155   :  { %783 = vst [vmem:[#allocation8 + $0x68] sm:$0xff] %v708_v33  ;;  %v990_v35 = vpop.f32.mrb[28].mxu1  ;;  %v927_v36 = vpop.f32.mrb[29].mxu0 }
 0x156   :  { %v928_v37 = vadd.f32 %v927_v36, %v926_v34  ;;  %v991_v38 = vpop.f32.mrb[29].mxu1  ;;  %v929_v39 = vpop.f32.mrb[30].mxu0 }
 0x157   :  { %v992_v40 = vadd.f32 %v991_v38, %v990_v35  ;;  %v993_v41 = vpop.f32.mrb[30].mxu1  ;;  %v930_v42 = vpop.f32.mrb[31].mxu0 }
 0x158   :  { %v931_v43 = vadd.f32 %v930_v42, %v929_v39  ;;  %v994_v44 = vpop.f32.mrb[31].mxu1 }
 0x159   :  { %v713_v45 = vadd.f32 %v992_v40, %v928_v37  ;;  %v995_v46 = vadd.f32 %v994_v44, %v993_v41 }
 0x15b   :  { %784 = vst [vmem:[#allocation8 + $0x70] sm:$0xff] %v713_v45  ;;  %v716_v47 = vadd.f32 %v995_v46, %v931_v43 }
 0x15d   :  { %785 = vst [vmem:[#allocation8 + $0x78] sm:$0xff] %v716_v47 }
 0x15e   :  { %1140 = shalt.err (!%p1137_p6)
}
 0x15f   :  { %s1141_s12 = scalar_lea.hbm %s1219_s2, 2048 }
 0x160   :  { %p1142_p7 = scmp.ne.s32.totalorder %s1219_s2, %s1141_s12  ;;  %p1145_p8 = scmp.lt.u32.totalorder %s1141_s12, %s1219_s2 }
 0x162   :  { %p1147_p9 = pnand %p1145_p8, %p1142_p7 }
 0x164   :  { %1150 = shalt.err (!%p1147_p9)
}
 0x165   :  { %s1164_s17 = smov 128   ;;  %s1165_s18 = smov 8  }
 0x166   :  { %797 = dma.vmem_to_hbm [thread:$0]  %s792_s8, 2048, %s1219_s2, [#allocation5], %s1164_s17, %s1164_s17, %s1165_s18  }
 0x167   :  { %1155 = dma.done.wait [#allocation5], 2048  }
 0x168   :  { %1156 = vsyncadd [#allocation5], 4294965248 }
 0x169   :  { %801 = vsyncpa [#allocation4], 1 }
 0x16a   :  { %802 = vsyncpa [#allocation7], 1 }
 0x16b   :  { %803 = vsyncpa [#allocation5], 1 }

</bundles_post_ra>
